<compile_context>
chip_gen: v7x
topology: tpu7x:2x2x1
jax: 0.10.0
libtpu: 0.0.40
codegen_flags: <defaults>
</compile_context>

<pallas_src>
import functools

import jax
import jax.numpy as jnp
from jax import lax
from jax.experimental import pallas as pl
from jax.experimental.pallas import tpu as pltpu


def _my_net_kernel(idx_ref, w1t_hbm, w2_ref, o_ref, h_ref, sem):
    """One vocab tile of the forward pass.

    idx_ref : (B,)   int32 token ids, SMEM (scalar prefetch)
    w1t_hbm : (V, E) embedding table = linear1.weight.T, left in HBM (pl.ANY)
    w2_ref  : (TN,E) VMEM tile of linear2.weight (native layout)
    o_ref   : (B,TN) output logits tile
    h_ref   : (B, E) VMEM scratch hidden activations
    sem     : (B,)   DMA semaphores for the row gather
    """
    B = h_ref.shape[0]

    # Gather the B embedding rows we actually need (tiny: B*E*4 bytes).
    # Re-done per grid step so every step is self-contained -> the vocab grid
    # axis can be "parallel" (v7x megacore) with no cross-step state.
    copies = []
    for b in range(B):
        token = idx_ref[b]
        cp = pltpu.make_async_copy(
            w1t_hbm.at[pl.ds(token, 1), :],
            h_ref.at[pl.ds(b, 1), :],
            sem.at[b],
        )
        cp.start()
        copies.append(cp)
    for cp in copies:
        cp.wait()

    # out_tile = h @ W2_tile^T  (contract on E). MXU handles the transposed
    # rhs natively, so no transpose of W2 is ever materialized.
    out = lax.dot_general(
        h_ref[...], w2_ref[...],
        dimension_numbers=(((1,), (1,)), ((), ())),
        preferred_element_type=jnp.float32,
    )
    o_ref[...] = out.astype(o_ref.dtype)


def _pick_vocab_tile(V, target=512):
    """Largest multiple-of-128 divisor of V that is <= target (lane dense)."""
    best = None
    t = 128
    while t <= min(target, V):
        if V % t == 0:
            best = t
        t += 128
    # TODO(synk): for V not a multiple of 128 we fall back to one full-width
    # tile; very large ragged vocabs would need padding + output slicing.
    return best if best is not None else V


@functools.partial(jax.jit, static_argnames=("tn",))
def my_net_forward(token_ids, w1t, w2, *, tn=None):
    """Forward of My_net for one-hot inputs given as token indices.

    token_ids : (B,) int32  -- positions of the 1s in the one-hot input x
    w1t       : (V, E) f32  -- linear1.weight.T (transposed ONCE at init)
    w2        : (V, E) f32  -- linear2.weight   (native nn.Linear layout)
    returns   : (B, V) logits == linear2(linear1(one_hot(token_ids, V)))
    """
    (B,) = token_ids.shape
    V, E = w1t.shape
    assert w2.shape == (V, E)

    if tn is None:
        tn = _pick_vocab_tile(V)
    num_tiles = V // tn

    itemsize = jnp.dtype(w2.dtype).itemsize
    cost = pl.CostEstimate(
        flops=2 * B * E * V,                      # the remaining (layer-2) matmul
        transcendentals=0,
        bytes_accessed=(V * E + B * E + B * V) * itemsize + B * 4,
    )

    # Double-buffered W2 tile + double-buffered output tile + h scratch, with
    # slack; capped well under v7x's 64 MiB physical VMEM.
    vmem_needed = 2 * tn * E * itemsize + 2 * B * tn * itemsize + B * E * 4
    vmem_limit = int(min(48 * 1024 * 1024,
                         max(8 * 1024 * 1024, 4 * vmem_needed)))

    return pl.pallas_call(
        _my_net_kernel,
        out_shape=jax.ShapeDtypeStruct((B, V), w2.dtype),
        grid_spec=pltpu.PrefetchScalarGridSpec(
            num_scalar_prefetch=1,                            # token_ids -> SMEM
            grid=(num_tiles,),
            in_specs=[
                pl.BlockSpec(memory_space=pl.ANY),            # W1^T stays in HBM
                pl.BlockSpec((tn, E), lambda j, idx: (j, 0)), # stream W2 tiles
            ],
            out_specs=pl.BlockSpec((B, tn), lambda j, idx: (0, j)),
            scratch_shapes=[
                pltpu.VMEM((B, E), jnp.float32),
                pltpu.SemaphoreType.DMA((B,)),
            ],
        ),
        compiler_params=pltpu.CompilerParams(
            dimension_semantics=("parallel",),
            vmem_limit_bytes=vmem_limit,
        ),
        cost_estimate=cost,
    )(token_ids, w1t, w2)


if __name__ == "__main__":
    # Small but tiling-demonstrating shapes: vocab=2048 -> 4 vocab tiles of 512.
    vocab_size = 2048
    embedding_size = 128
    batch = 8        # note: at B=8 the kernel is pure weight streaming (HBM-bound)

    key = jax.random.PRNGKey(0)
    kx, k1, k2 = jax.random.split(key, 3)

    # word2vec feeds one-hot vectors; pass their indices directly.
    token_ids = jax.random.randint(kx, (batch,), 0, vocab_size, dtype=jnp.int32)

    # nn.Linear weight shapes: linear1.weight (E, V), linear2.weight (V, E).
    w1 = jax.random.normal(k1, (embedding_size, vocab_size), jnp.float32) * 0.02
    w2 = jax.random.normal(k2, (vocab_size, embedding_size), jnp.float32) * 0.02

    # Init-time (once, outside the per-call path): store W1 pre-transposed.
    w1t = jnp.asarray(w1.T)                                   # (V, E)

    out = my_net_forward(token_ids, w1t, w2)
    out = jax.block_until_ready(out)

    # Reference: exact PyTorch forward math on the equivalent one-hot input.
    x = jax.nn.one_hot(token_ids, vocab_size, dtype=jnp.float32)  # (B, V)
    ref = (x @ w1.T) @ w2.T
    assert out.shape == (batch, vocab_size)
    assert jnp.allclose(out, ref, atol=1e-4, rtol=1e-4), float(
        jnp.max(jnp.abs(out - ref)))

    print("KERNEL_OK")
</pallas_src>

<mosaic_0001>
module attributes {stable_mosaic.version = 11 : i64} {
  func.func @_my_net_kernel(%arg0: i32, %arg1: memref<8xi32, #tpu.memory_space<smem>>, %arg2: memref<2048x128xf32, #tpu.memory_space<any>>, %arg3: memref<512x128xf32, #tpu.memory_space<vmem>>, %arg4: memref<8x512xf32, #tpu.memory_space<vmem>>, %arg5: memref<8x128xf32, #tpu.memory_space<vmem>>, %arg6: memref<8x!tpu.dma_semaphore, #tpu.memory_space<semaphore_mem>>) attributes {dimension_semantics = [#tpu.dimension_semantics<parallel>], iteration_bounds = array<i64: 4>, scalar_prefetch = 1 : i64, scratch_operands = 2 : i64, tpu.core_type = #tpu.core_type<tc>, window_params = [{}, {transform_indices = @transform_1, window_bounds = array<i64: 512, 128>}, {transform_indices = @transform_2, window_bounds = array<i64: 8, 512>}]} {
    %c0 = arith.constant 0 : index
    %0 = memref.load %arg1[%c0] : memref<8xi32, #tpu.memory_space<smem>>
    %c0_i32 = arith.constant 0 : i32
    %c0_i32_0 = arith.constant 0 : i32
    %1 = tpu.memref_slice %arg2[%0, %c0_i32_0] : memref<2048x128xf32, #tpu.memory_space<any>> -> memref<1x128xf32, #tpu.memory_space<any>>
    %c0_i32_1 = arith.constant 0 : i32
    %c0_i32_2 = arith.constant 0 : i32
    %2 = tpu.memref_slice %arg5[%c0_i32_1, %c0_i32_2] : memref<8x128xf32, #tpu.memory_space<vmem>> -> memref<1x128xf32, #tpu.memory_space<vmem>>
    %3 = tpu.memref_slice %arg6[%c0_i32] : memref<8x!tpu.dma_semaphore, #tpu.memory_space<semaphore_mem>> -> memref<1x!tpu.dma_semaphore, #tpu.memory_space<semaphore_mem>>
    %4 = tpu.memref_squeeze %3 : memref<1x!tpu.dma_semaphore, #tpu.memory_space<semaphore_mem>> -> memref<!tpu.dma_semaphore, #tpu.memory_space<semaphore_mem>>
    tpu.enqueue_dma source(%1 : memref<1x128xf32, #tpu.memory_space<any>>) target(%2 : memref<1x128xf32, #tpu.memory_space<vmem>>) target_semaphore(%4 : memref<!tpu.dma_semaphore, #tpu.memory_space<semaphore_mem>>)
    %c1 = arith.constant 1 : index
    %5 = memref.load %arg1[%c1] : memref<8xi32, #tpu.memory_space<smem>>
    %c1_i32 = arith.constant 1 : i32
    %c0_i32_3 = arith.constant 0 : i32
    %6 = tpu.memref_slice %arg2[%5, %c0_i32_3] : memref<2048x128xf32, #tpu.memory_space<any>> -> memref<1x128xf32, #tpu.memory_space<any>>
    %c1_i32_4 = arith.constant 1 : i32
    %c0_i32_5 = arith.constant 0 : i32
    %7 = tpu.memref_slice %arg5[%c1_i32_4, %c0_i32_5] : memref<8x128xf32, #tpu.memory_space<vmem>> -> memref<1x128xf32, #tpu.memory_space<vmem>>
    %8 = tpu.memref_slice %arg6[%c1_i32] : memref<8x!tpu.dma_semaphore, #tpu.memory_space<semaphore_mem>> -> memref<1x!tpu.dma_semaphore, #tpu.memory_space<semaphore_mem>>
    %9 = tpu.memref_squeeze %8 : memref<1x!tpu.dma_semaphore, #tpu.memory_space<semaphore_mem>> -> memref<!tpu.dma_semaphore, #tpu.memory_space<semaphore_mem>>
    tpu.enqueue_dma source(%6 : memref<1x128xf32, #tpu.memory_space<any>>) target(%7 : memref<1x128xf32, #tpu.memory_space<vmem>>) target_semaphore(%9 : memref<!tpu.dma_semaphore, #tpu.memory_space<semaphore_mem>>)
    %c2 = arith.constant 2 : index
    %10 = memref.load %arg1[%c2] : memref<8xi32, #tpu.memory_space<smem>>
    %c2_i32 = arith.constant 2 : i32
    %c0_i32_6 = arith.constant 0 : i32
    %11 = tpu.memref_slice %arg2[%10, %c0_i32_6] : memref<2048x128xf32, #tpu.memory_space<any>> -> memref<1x128xf32, #tpu.memory_space<any>>
    %c2_i32_7 = arith.constant 2 : i32
    %c0_i32_8 = arith.constant 0 : i32
    %12 = tpu.memref_slice %arg5[%c2_i32_7, %c0_i32_8] : memref<8x128xf32, #tpu.memory_space<vmem>> -> memref<1x128xf32, #tpu.memory_space<vmem>>
    %13 = tpu.memref_slice %arg6[%c2_i32] : memref<8x!tpu.dma_semaphore, #tpu.memory_space<semaphore_mem>> -> memref<1x!tpu.dma_semaphore, #tpu.memory_space<semaphore_mem>>
    %14 = tpu.memref_squeeze %13 : memref<1x!tpu.dma_semaphore, #tpu.memory_space<semaphore_mem>> -> memref<!tpu.dma_semaphore, #tpu.memory_space<semaphore_mem>>
    tpu.enqueue_dma source(%11 : memref<1x128xf32, #tpu.memory_space<any>>) target(%12 : memref<1x128xf32, #tpu.memory_space<vmem>>) target_semaphore(%14 : memref<!tpu.dma_semaphore, #tpu.memory_space<semaphore_mem>>)
    %c3 = arith.constant 3 : index
    %15 = memref.load %arg1[%c3] : memref<8xi32, #tpu.memory_space<smem>>
    %c3_i32 = arith.constant 3 : i32
    %c0_i32_9 = arith.constant 0 : i32
    %16 = tpu.memref_slice %arg2[%15, %c0_i32_9] : memref<2048x128xf32, #tpu.memory_space<any>> -> memref<1x128xf32, #tpu.memory_space<any>>
    %c3_i32_10 = arith.constant 3 : i32
    %c0_i32_11 = arith.constant 0 : i32
    %17 = tpu.memref_slice %arg5[%c3_i32_10, %c0_i32_11] : memref<8x128xf32, #tpu.memory_space<vmem>> -> memref<1x128xf32, #tpu.memory_space<vmem>>
    %18 = tpu.memref_slice %arg6[%c3_i32] : memref<8x!tpu.dma_semaphore, #tpu.memory_space<semaphore_mem>> -> memref<1x!tpu.dma_semaphore, #tpu.memory_space<semaphore_mem>>
    %19 = tpu.memref_squeeze %18 : memref<1x!tpu.dma_semaphore, #tpu.memory_space<semaphore_mem>> -> memref<!tpu.dma_semaphore, #tpu.memory_space<semaphore_mem>>
    tpu.enqueue_dma source(%16 : memref<1x128xf32, #tpu.memory_space<any>>) target(%17 : memref<1x128xf32, #tpu.memory_space<vmem>>) target_semaphore(%19 : memref<!tpu.dma_semaphore, #tpu.memory_space<semaphore_mem>>)
    %c4 = arith.constant 4 : index
    %20 = memref.load %arg1[%c4] : memref<8xi32, #tpu.memory_space<smem>>
    %c4_i32 = arith.constant 4 : i32
    %c0_i32_12 = arith.constant 0 : i32
    %21 = tpu.memref_slice %arg2[%20, %c0_i32_12] : memref<2048x128xf32, #tpu.memory_space<any>> -> memref<1x128xf32, #tpu.memory_space<any>>
    %c4_i32_13 = arith.constant 4 : i32
    %c0_i32_14 = arith.constant 0 : i32
    %22 = tpu.memref_slice %arg5[%c4_i32_13, %c0_i32_14] : memref<8x128xf32, #tpu.memory_space<vmem>> -> memref<1x128xf32, #tpu.memory_space<vmem>>
    %23 = tpu.memref_slice %arg6[%c4_i32] : memref<8x!tpu.dma_semaphore, #tpu.memory_space<semaphore_mem>> -> memref<1x!tpu.dma_semaphore, #tpu.memory_space<semaphore_mem>>
    %24 = tpu.memref_squeeze %23 : memref<1x!tpu.dma_semaphore, #tpu.memory_space<semaphore_mem>> -> memref<!tpu.dma_semaphore, #tpu.memory_space<semaphore_mem>>
    tpu.enqueue_dma source(%21 : memref<1x128xf32, #tpu.memory_space<any>>) target(%22 : memref<1x128xf32, #tpu.memory_space<vmem>>) target_semaphore(%24 : memref<!tpu.dma_semaphore, #tpu.memory_space<semaphore_mem>>)
    %c5 = arith.constant 5 : index
    %25 = memref.load %arg1[%c5] : memref<8xi32, #tpu.memory_space<smem>>
    %c5_i32 = arith.constant 5 : i32
    %c0_i32_15 = arith.constant 0 : i32
    %26 = tpu.memref_slice %arg2[%25, %c0_i32_15] : memref<2048x128xf32, #tpu.memory_space<any>> -> memref<1x128xf32, #tpu.memory_space<any>>
    %c5_i32_16 = arith.constant 5 : i32
    %c0_i32_17 = arith.constant 0 : i32
    %27 = tpu.memref_slice %arg5[%c5_i32_16, %c0_i32_17] : memref<8x128xf32, #tpu.memory_space<vmem>> -> memref<1x128xf32, #tpu.memory_space<vmem>>
    %28 = tpu.memref_slice %arg6[%c5_i32] : memref<8x!tpu.dma_semaphore, #tpu.memory_space<semaphore_mem>> -> memref<1x!tpu.dma_semaphore, #tpu.memory_space<semaphore_mem>>
    %29 = tpu.memref_squeeze %28 : memref<1x!tpu.dma_semaphore, #tpu.memory_space<semaphore_mem>> -> memref<!tpu.dma_semaphore, #tpu.memory_space<semaphore_mem>>
    tpu.enqueue_dma source(%26 : memref<1x128xf32, #tpu.memory_space<any>>) target(%27 : memref<1x128xf32, #tpu.memory_space<vmem>>) target_semaphore(%29 : memref<!tpu.dma_semaphore, #tpu.memory_space<semaphore_mem>>)
    %c6 = arith.constant 6 : index
    %30 = memref.load %arg1[%c6] : memref<8xi32, #tpu.memory_space<smem>>
    %c6_i32 = arith.constant 6 : i32
    %c0_i32_18 = arith.constant 0 : i32
    %31 = tpu.memref_slice %arg2[%30, %c0_i32_18] : memref<2048x128xf32, #tpu.memory_space<any>> -> memref<1x128xf32, #tpu.memory_space<any>>
    %c6_i32_19 = arith.constant 6 : i32
    %c0_i32_20 = arith.constant 0 : i32
    %32 = tpu.memref_slice %arg5[%c6_i32_19, %c0_i32_20] : memref<8x128xf32, #tpu.memory_space<vmem>> -> memref<1x128xf32, #tpu.memory_space<vmem>>
    %33 = tpu.memref_slice %arg6[%c6_i32] : memref<8x!tpu.dma_semaphore, #tpu.memory_space<semaphore_mem>> -> memref<1x!tpu.dma_semaphore, #tpu.memory_space<semaphore_mem>>
    %34 = tpu.memref_squeeze %33 : memref<1x!tpu.dma_semaphore, #tpu.memory_space<semaphore_mem>> -> memref<!tpu.dma_semaphore, #tpu.memory_space<semaphore_mem>>
    tpu.enqueue_dma source(%31 : memref<1x128xf32, #tpu.memory_space<any>>) target(%32 : memref<1x128xf32, #tpu.memory_space<vmem>>) target_semaphore(%34 : memref<!tpu.dma_semaphore, #tpu.memory_space<semaphore_mem>>)
    %c7 = arith.constant 7 : index
    %35 = memref.load %arg1[%c7] : memref<8xi32, #tpu.memory_space<smem>>
    %c7_i32 = arith.constant 7 : i32
    %c0_i32_21 = arith.constant 0 : i32
    %36 = tpu.memref_slice %arg2[%35, %c0_i32_21] : memref<2048x128xf32, #tpu.memory_space<any>> -> memref<1x128xf32, #tpu.memory_space<any>>
    %c7_i32_22 = arith.constant 7 : i32
    %c0_i32_23 = arith.constant 0 : i32
    %37 = tpu.memref_slice %arg5[%c7_i32_22, %c0_i32_23] : memref<8x128xf32, #tpu.memory_space<vmem>> -> memref<1x128xf32, #tpu.memory_space<vmem>>
    %38 = tpu.memref_slice %arg6[%c7_i32] : memref<8x!tpu.dma_semaphore, #tpu.memory_space<semaphore_mem>> -> memref<1x!tpu.dma_semaphore, #tpu.memory_space<semaphore_mem>>
    %39 = tpu.memref_squeeze %38 : memref<1x!tpu.dma_semaphore, #tpu.memory_space<semaphore_mem>> -> memref<!tpu.dma_semaphore, #tpu.memory_space<semaphore_mem>>
    tpu.enqueue_dma source(%36 : memref<1x128xf32, #tpu.memory_space<any>>) target(%37 : memref<1x128xf32, #tpu.memory_space<vmem>>) target_semaphore(%39 : memref<!tpu.dma_semaphore, #tpu.memory_space<semaphore_mem>>)
    %c0_i32_24 = arith.constant 0 : i32
    %c0_i32_25 = arith.constant 0 : i32
    %40 = tpu.memref_slice %arg2[%0, %c0_i32_25] : memref<2048x128xf32, #tpu.memory_space<any>> -> memref<1x128xf32, #tpu.memory_space<any>>
    %c0_i32_26 = arith.constant 0 : i32
    %c0_i32_27 = arith.constant 0 : i32
    %41 = tpu.memref_slice %arg5[%c0_i32_26, %c0_i32_27] : memref<8x128xf32, #tpu.memory_space<vmem>> -> memref<1x128xf32, #tpu.memory_space<vmem>>
    %42 = tpu.memref_slice %arg6[%c0_i32_24] : memref<8x!tpu.dma_semaphore, #tpu.memory_space<semaphore_mem>> -> memref<1x!tpu.dma_semaphore, #tpu.memory_space<semaphore_mem>>
    %43 = tpu.memref_squeeze %42 : memref<1x!tpu.dma_semaphore, #tpu.memory_space<semaphore_mem>> -> memref<!tpu.dma_semaphore, #tpu.memory_space<semaphore_mem>>
    tpu.wait_dma2 semaphore(%43 : memref<!tpu.dma_semaphore, #tpu.memory_space<semaphore_mem>>) src(%40 : memref<1x128xf32, #tpu.memory_space<any>>) dst(%41 : memref<1x128xf32, #tpu.memory_space<vmem>>)
    %c1_i32_28 = arith.constant 1 : i32
    %c0_i32_29 = arith.constant 0 : i32
    %44 = tpu.memref_slice %arg2[%5, %c0_i32_29] : memref<2048x128xf32, #tpu.memory_space<any>> -> memref<1x128xf32, #tpu.memory_space<any>>
    %c1_i32_30 = arith.constant 1 : i32
    %c0_i32_31 = arith.constant 0 : i32
    %45 = tpu.memref_slice %arg5[%c1_i32_30, %c0_i32_31] : memref<8x128xf32, #tpu.memory_space<vmem>> -> memref<1x128xf32, #tpu.memory_space<vmem>>
    %46 = tpu.memref_slice %arg6[%c1_i32_28] : memref<8x!tpu.dma_semaphore, #tpu.memory_space<semaphore_mem>> -> memref<1x!tpu.dma_semaphore, #tpu.memory_space<semaphore_mem>>
    %47 = tpu.memref_squeeze %46 : memref<1x!tpu.dma_semaphore, #tpu.memory_space<semaphore_mem>> -> memref<!tpu.dma_semaphore, #tpu.memory_space<semaphore_mem>>
    tpu.wait_dma2 semaphore(%47 : memref<!tpu.dma_semaphore, #tpu.memory_space<semaphore_mem>>) src(%44 : memref<1x128xf32, #tpu.memory_space<any>>) dst(%45 : memref<1x128xf32, #tpu.memory_space<vmem>>)
    %c2_i32_32 = arith.constant 2 : i32
    %c0_i32_33 = arith.constant 0 : i32
    %48 = tpu.memref_slice %arg2[%10, %c0_i32_33] : memref<2048x128xf32, #tpu.memory_space<any>> -> memref<1x128xf32, #tpu.memory_space<any>>
    %c2_i32_34 = arith.constant 2 : i32
    %c0_i32_35 = arith.constant 0 : i32
    %49 = tpu.memref_slice %arg5[%c2_i32_34, %c0_i32_35] : memref<8x128xf32, #tpu.memory_space<vmem>> -> memref<1x128xf32, #tpu.memory_space<vmem>>
    %50 = tpu.memref_slice %arg6[%c2_i32_32] : memref<8x!tpu.dma_semaphore, #tpu.memory_space<semaphore_mem>> -> memref<1x!tpu.dma_semaphore, #tpu.memory_space<semaphore_mem>>
    %51 = tpu.memref_squeeze %50 : memref<1x!tpu.dma_semaphore, #tpu.memory_space<semaphore_mem>> -> memref<!tpu.dma_semaphore, #tpu.memory_space<semaphore_mem>>
    tpu.wait_dma2 semaphore(%51 : memref<!tpu.dma_semaphore, #tpu.memory_space<semaphore_mem>>) src(%48 : memref<1x128xf32, #tpu.memory_space<any>>) dst(%49 : memref<1x128xf32, #tpu.memory_space<vmem>>)
    %c3_i32_36 = arith.constant 3 : i32
    %c0_i32_37 = arith.constant 0 : i32
    %52 = tpu.memref_slice %arg2[%15, %c0_i32_37] : memref<2048x128xf32, #tpu.memory_space<any>> -> memref<1x128xf32, #tpu.memory_space<any>>
    %c3_i32_38 = arith.constant 3 : i32
    %c0_i32_39 = arith.constant 0 : i32
    %53 = tpu.memref_slice %arg5[%c3_i32_38, %c0_i32_39] : memref<8x128xf32, #tpu.memory_space<vmem>> -> memref<1x128xf32, #tpu.memory_space<vmem>>
    %54 = tpu.memref_slice %arg6[%c3_i32_36] : memref<8x!tpu.dma_semaphore, #tpu.memory_space<semaphore_mem>> -> memref<1x!tpu.dma_semaphore, #tpu.memory_space<semaphore_mem>>
    %55 = tpu.memref_squeeze %54 : memref<1x!tpu.dma_semaphore, #tpu.memory_space<semaphore_mem>> -> memref<!tpu.dma_semaphore, #tpu.memory_space<semaphore_mem>>
    tpu.wait_dma2 semaphore(%55 : memref<!tpu.dma_semaphore, #tpu.memory_space<semaphore_mem>>) src(%52 : memref<1x128xf32, #tpu.memory_space<any>>) dst(%53 : memref<1x128xf32, #tpu.memory_space<vmem>>)
    %c4_i32_40 = arith.constant 4 : i32
    %c0_i32_41 = arith.constant 0 : i32
    %56 = tpu.memref_slice %arg2[%20, %c0_i32_41] : memref<2048x128xf32, #tpu.memory_space<any>> -> memref<1x128xf32, #tpu.memory_space<any>>
    %c4_i32_42 = arith.constant 4 : i32
    %c0_i32_43 = arith.constant 0 : i32
    %57 = tpu.memref_slice %arg5[%c4_i32_42, %c0_i32_43] : memref<8x128xf32, #tpu.memory_space<vmem>> -> memref<1x128xf32, #tpu.memory_space<vmem>>
    %58 = tpu.memref_slice %arg6[%c4_i32_40] : memref<8x!tpu.dma_semaphore, #tpu.memory_space<semaphore_mem>> -> memref<1x!tpu.dma_semaphore, #tpu.memory_space<semaphore_mem>>
    %59 = tpu.memref_squeeze %58 : memref<1x!tpu.dma_semaphore, #tpu.memory_space<semaphore_mem>> -> memref<!tpu.dma_semaphore, #tpu.memory_space<semaphore_mem>>
    tpu.wait_dma2 semaphore(%59 : memref<!tpu.dma_semaphore, #tpu.memory_space<semaphore_mem>>) src(%56 : memref<1x128xf32, #tpu.memory_space<any>>) dst(%57 : memref<1x128xf32, #tpu.memory_space<vmem>>)
    %c5_i32_44 = arith.constant 5 : i32
    %c0_i32_45 = arith.constant 0 : i32
    %60 = tpu.memref_slice %arg2[%25, %c0_i32_45] : memref<2048x128xf32, #tpu.memory_space<any>> -> memref<1x128xf32, #tpu.memory_space<any>>
    %c5_i32_46 = arith.constant 5 : i32
    %c0_i32_47 = arith.constant 0 : i32
    %61 = tpu.memref_slice %arg5[%c5_i32_46, %c0_i32_47] : memref<8x128xf32, #tpu.memory_space<vmem>> -> memref<1x128xf32, #tpu.memory_space<vmem>>
    %62 = tpu.memref_slice %arg6[%c5_i32_44] : memref<8x!tpu.dma_semaphore, #tpu.memory_space<semaphore_mem>> -> memref<1x!tpu.dma_semaphore, #tpu.memory_space<semaphore_mem>>
    %63 = tpu.memref_squeeze %62 : memref<1x!tpu.dma_semaphore, #tpu.memory_space<semaphore_mem>> -> memref<!tpu.dma_semaphore, #tpu.memory_space<semaphore_mem>>
    tpu.wait_dma2 semaphore(%63 : memref<!tpu.dma_semaphore, #tpu.memory_space<semaphore_mem>>) src(%60 : memref<1x128xf32, #tpu.memory_space<any>>) dst(%61 : memref<1x128xf32, #tpu.memory_space<vmem>>)
    %c6_i32_48 = arith.constant 6 : i32
    %c0_i32_49 = arith.constant 0 : i32
    %64 = tpu.memref_slice %arg2[%30, %c0_i32_49] : memref<2048x128xf32, #tpu.memory_space<any>> -> memref<1x128xf32, #tpu.memory_space<any>>
    %c6_i32_50 = arith.constant 6 : i32
    %c0_i32_51 = arith.constant 0 : i32
    %65 = tpu.memref_slice %arg5[%c6_i32_50, %c0_i32_51] : memref<8x128xf32, #tpu.memory_space<vmem>> -> memref<1x128xf32, #tpu.memory_space<vmem>>
    %66 = tpu.memref_slice %arg6[%c6_i32_48] : memref<8x!tpu.dma_semaphore, #tpu.memory_space<semaphore_mem>> -> memref<1x!tpu.dma_semaphore, #tpu.memory_space<semaphore_mem>>
    %67 = tpu.memref_squeeze %66 : memref<1x!tpu.dma_semaphore, #tpu.memory_space<semaphore_mem>> -> memref<!tpu.dma_semaphore, #tpu.memory_space<semaphore_mem>>
    tpu.wait_dma2 semaphore(%67 : memref<!tpu.dma_semaphore, #tpu.memory_space<semaphore_mem>>) src(%64 : memref<1x128xf32, #tpu.memory_space<any>>) dst(%65 : memref<1x128xf32, #tpu.memory_space<vmem>>)
    %c7_i32_52 = arith.constant 7 : i32
    %c0_i32_53 = arith.constant 0 : i32
    %68 = tpu.memref_slice %arg2[%35, %c0_i32_53] : memref<2048x128xf32, #tpu.memory_space<any>> -> memref<1x128xf32, #tpu.memory_space<any>>
    %c7_i32_54 = arith.constant 7 : i32
    %c0_i32_55 = arith.constant 0 : i32
    %69 = tpu.memref_slice %arg5[%c7_i32_54, %c0_i32_55] : memref<8x128xf32, #tpu.memory_space<vmem>> -> memref<1x128xf32, #tpu.memory_space<vmem>>
    %70 = tpu.memref_slice %arg6[%c7_i32_52] : memref<8x!tpu.dma_semaphore, #tpu.memory_space<semaphore_mem>> -> memref<1x!tpu.dma_semaphore, #tpu.memory_space<semaphore_mem>>
    %71 = tpu.memref_squeeze %70 : memref<1x!tpu.dma_semaphore, #tpu.memory_space<semaphore_mem>> -> memref<!tpu.dma_semaphore, #tpu.memory_space<semaphore_mem>>
    tpu.wait_dma2 semaphore(%71 : memref<!tpu.dma_semaphore, #tpu.memory_space<semaphore_mem>>) src(%68 : memref<1x128xf32, #tpu.memory_space<any>>) dst(%69 : memref<1x128xf32, #tpu.memory_space<vmem>>)
    %c0_56 = arith.constant 0 : index
    %c0_57 = arith.constant 0 : index
    %72 = vector.load %arg5[%c0_56, %c0_57] : memref<8x128xf32, #tpu.memory_space<vmem>>, vector<8x128xf32>
    %c0_58 = arith.constant 0 : index
    %c0_59 = arith.constant 0 : index
    %73 = vector.load %arg3[%c0_58, %c0_59] : memref<512x128xf32, #tpu.memory_space<vmem>>, vector<512x128xf32>
    %cst = arith.constant dense<0.000000e+00> : vector<8x512xf32>
    %74 = tpu.matmul %72, %73, %cst {dimension_numbers = #tpu.dot_dimension_numbers<[1], [1], [0], [0], [0, 0, 1, 0], [], []>} : vector<8x128xf32>, vector<512x128xf32>, vector<8x512xf32> -> vector<8x512xf32>
    %c0_60 = arith.constant 0 : index
    %c0_61 = arith.constant 0 : index
    %75 = vector.load %arg4[%c0_60, %c0_61] : memref<8x512xf32, #tpu.memory_space<vmem>>, vector<8x512xf32>
    tpu.vector_store %arg4[%c0_60, %c0_61], %74 {strides = array<i32>} : memref<8x512xf32, #tpu.memory_space<vmem>>, vector<8x512xf32>,
    return
  }
  func.func @transform_1(%arg0: i32, %arg1: memref<8xi32, #tpu.memory_space<smem>>) -> (i32, i32) {
    %c0_i32 = arith.constant 0 : i32
    %c0_i32_0 = arith.constant 0 : i32
    return %arg0, %c0_i32 : i32, i32
  }
  func.func @transform_2(%arg0: i32, %arg1: memref<8xi32, #tpu.memory_space<smem>>) -> (i32, i32) {
    %c0_i32 = arith.constant 0 : i32
    %c0_i32_0 = arith.constant 0 : i32
    return %c0_i32, %arg0 : i32, i32
  }
}

</mosaic_0001>

<bundles_post_ra>
// kernel: my_net_forward.1
= control target key start
LH: loop header
LB: loop body
LE: loop exit
PB: predicated region body
PF: predicated region fallthrough
CT: control target
= control target key end

     0   :  { %s1612_s0 = inlined_call_operand.hbm [shape: s32[8], index: 0, kind: input, shape index: {}]   ;;  %s1613_s1 = inlined_call_operand.hbm [shape: f32[2048,128], index: 1, kind: input, shape index: {}]   ;;  %s1614_s2 = inlined_call_operand.hbm [shape: f32[2048,128], index: 2, kind: input, shape index: {}]   ;;  %s1615_s3 = inlined_call_operand.hbm [shape: f32[8,2048], index: 3, kind: output, shape index: {}]  }
   0x1   :  { %1617 = sst [smem:[#allocation40_spill]] %s1614_s2  ;;  %s881_s14 = scalar_lea.hbm %s1612_s0, 16 }
   0x2   :  { %p882_p0 = scmp.ne.s32.totalorder %s1612_s0, %s881_s14  ;;  %p885_p1 = scmp.lt.u32.totalorder %s881_s14, %s1612_s0 }
   0x4   :  { %p887_p2 = pnand %p885_p1, %p882_p0 }
   0x6   :  { %890 = shalt.err (!%p887_p2)  }
   0x7   :  { %s1199_s19 = smov [#allocation5]  }
   0x8   :  { %9 = dma.hbm_to_smem %s1612_s0, 16, %s1199_s19, [#allocation4] }
   0x9   :  { %1157 = dma.done.wait [#allocation4], 16 }
   0xa   :  { %1158 = vsyncadd [#allocation4], 4294967280 }
   0xb   :  { %11 = sfence }
   0xc   :  { %12 = vsyncpa [#allocation7], 0 }
   0xd   :  { %14 = vsyncpa [#allocation7 + $0x1], 0 }
   0xe   :  { %15 = vsyncpa [#allocation8], 0 }
   0xf   :  { %17 = vsyncpa [#allocation8 + $0x1], 0  ;;  %s1244_s22 = smov 0   ;;  %s1246_s23 = smov 0  }
  0x10   :  { %s1248_s24 = smov 0   ;;  %s1250_s25 = smov 0  }
  0x11 LB: > { %s1265_s0 = sadd.s32 4294967295, %s1197_s25   ;;  %s653_s26 = sadd.s32 4294967294, %s1197_s25   ;;  %s1197_s25 = sphi %s1250_s25, %s1632_s25   ;;  %s1193_s24 = sphi %s1248_s24, %s1631_s24   ;;  %s1189_s23 = sphi %s1246_s23, %s1630_s23   ;;  %s1185_s22 = sphi %s1244_s22, %s1629_s22  }
  0x12   : > { %s1269_s27 = sadd.s32 1, %s1197_s25   ;;  %s30_s28 = sadd.s32 1, %s1193_s24 }
  0x13   : > { %s27_s29 = ssub.s32 %s1197_s25, %s1269_s27  ;;  %p37_p3 = scmp.ne.s32.totalorder %s1193_s24, %s1189_s23 }
  0x14   : > { %p28_p4 = scmp.eq.s32.totalorder %s27_s29, 0  ;;  %p38_p5 = scmp.eq.s32.totalorder %s1197_s25, 0 }
  0x15   : > { %p43_p6 = scmp.ne.s32.totalorder %s1189_s23, %s1185_s22  ;;  %p44_p7 = scmp.eq.s32.totalorder %s1265_s0, 0 }
  0x16   : > { %s1281_s30 = scalar_select %p28_p4, %s1193_s24, %s30_s28  }
  0x17   : > { %p1283_p8 = por %p38_p5, %p37_p3  ;;  %p1287_p9 = por %p44_p7, %p43_p6 }
  0x18   : > { %1618 = sst [smem:[#allocation39_spill]] %s1281_s30  ;;  %p67_p10 = scmp.eq.s32.totalorder %s1265_s0, 3 }
  0x19   : > { %p73_p11 = scmp.eq.s32.totalorder %s653_s26, 3  ;;  %p836_p12 = scmp.lt.s32.totalorder %s1197_s25, 4 }
  0x1a   : > { %p1293_p13 = por %p67_p10, %p37_p3  ;;  %s93_s8 = sand.u32 1, %s1193_s24  }
  0x1b   : > { %p1297_p0 = por %p73_p11, %p43_p6  ;;  %s690_s9 = sshll.u32 %s1197_s25, 13 }
  0x1c   : > { %s1621_s6 = scalar_select %p1293_p13, 1, 0 }
  0x1d   : > { %s1622_s7 = scalar_select %p1297_p0, 1, 0 }
  0x1e   : > { %s656_s10 = sshll.u32 %s93_s8, 9  ;;  %s1623_s2 = sld [smem:[#allocation40_spill]] }
  0x1f   : > { %s97_s14 = scalar_lea.vmem [#allocation6], %s656_s10  ;;  %p1310_p1 = pnand %p836_p12, %p1283_p8 }
  0x20   : > { %s104_s15 = sshll.u32 %s97_s14, 4  ;;  %s1316_s17 = scalar_lea.sflag [#allocation7], %s93_s8  ;;  %s1314_s15 = int_to_ptr.vmem [resolvable:$true] %s104_s15 }
  0x21   : > { %p893_p3 = pneg %p1310_p1 }
  0x24   : > { %s1306_s13 = scalar_lea.hbm %s1623_s2, %s690_s9  ;;  %s896_s21 = scalar_lea.hbm %s1623_s2, 32768 }
  0x25   : > { %s891_s18 = scalar_lea.hbm %s1306_s13, 8192  ;;  %p897_p6 = scmp.lt.u32.totalorder %s1306_s13, %s1623_s2 }
  0x26   : > { %p892_p2 = scmp.ne.s32.totalorder %s1306_s13, %s891_s18  ;;  %p898_p7 = scmp.lt.u32.totalorder %s896_s21, %s891_s18 }
  0x27   : > { %p900_p10 = scmp.lt.u32.totalorder %s891_s18, %s1306_s13 }
  0x28   : > { %p894_p4 = pnand %p893_p3, %p892_p2  ;;  %p899_p8 = por %p898_p7, %p897_p6 }
  0x2a   : > { %p895_p5 = pneg %p894_p4  ;;  %p901_p11 = por %p900_p10, %p899_p8 }
  0x2c   : > { %p902_p12 = pnand %p901_p11, %p895_p5 }
  0x2e   : > { %905 = shalt.err (!%p902_p12)
}
  0x2f   : > { %s906_s29 = scalar_lea.vmem %s1314_s15, 8192  ;;  %s1200_s4 = smov [#allocation6]  }
  0x30   : > { %p907_p2 = scmp.ne.s32.totalorder %s1314_s15, %s906_s29  ;;  %s911_s8 = sshll.u32 %s1200_s4, 4  ;;  %s912_s8 = int_to_ptr.vmem [resolvable:$false] %s911_s8 }
  0x31   : > { %s913_s9 = scalar_lea.vmem %s912_s8, 16384  ;;  %p914_p13 = scmp.lt.s32.totalorder %s1314_s15, %s912_s8 }
  0x32   : > { %p909_p4 = pnand %p907_p2, %p893_p3  ;;  %p915_p6 = scmp.lt.s32.totalorder %s913_s9, %s906_s29 }
  0x34   : > { %p910_p0 = pneg %p909_p4  ;;  %p916_p7 = por %p915_p6, %p914_p13 }
  0x36   : > { %p917_p8 = pnand %p916_p7, %p910_p0 }
  0x38   : > { %920 = shalt.err (!%p917_p8)
}
  0x39   : > { %s1201_s10 = smov 128   ;;  %s1202_s11 = smov 8  }
  0x3a   : > { %831 = dma.hbm_to_vmem [thread:$0]  (!%p1310_p1), %s1306_s13, 8192, %s1314_s15, %s1316_s17, %s1201_s10, %s1201_s10, %s1202_s11  }
  0x3b   : > { %p659_p3 = scmp.ge.s32.totalorder %s1197_s25, 1  ;;  %p112_p5 = scmp.lt.s32.totalorder %s1197_s25, 5 }
  0x3d   : > { %p113_p10 = pnand %p659_p3, %p112_p5 }
  0x3e   : > { %s1347_s12 = sand.u32 (!%p113_p10), 1, %s1189_s23  }
  0x3f   : > { %116 = sbr.rel (%p113_p10) target bundleno = 560 (0x230), region = 24  ;;  %s660_s14 = sshll.u32 (!%p113_p10), %s1347_s12, 9 }
  0x40   : > { %s119_s18 = scalar_lea.sflag (!%p113_p10), [#allocation7], %s1347_s12  ;;  %s1351_s19 = scalar_lea.vmem (!%p113_p10), [#allocation6], %s660_s14 }
  0x46   : > { %1160 = dma.done.wait (%p1287_p9), %s119_s18, 8192  }
  0x47   : > { %1162 = vsyncadd (%p1287_p9), %s119_s18, 4294959104  ;;  %s143_s15 = sld [smem:[#allocation5]]  ;;  %s1203_s16 = smov [#allocation2]  }
  0x48   : > { %s153_s17 = sshll.u32 %s1203_s16, 4  ;;  %s1358_s20 = sld [smem:[#allocation5 + $0x1]]  ;;  %s1360_s17 = int_to_ptr.vmem [resolvable:$true] %s153_s17 }
  0x49   : > { %s1204_s21 = smov [#allocation2 + $0x1]   ;;  %s1362_s28 = sld [smem:[#allocation5 + $0x2]] }
  0x4a   : > { %s169_s26 = sshll.u32 %s1204_s21, 4  ;;  %s1205_s29 = smov [#allocation2 + $0x2]   ;;  %s1364_s26 = int_to_ptr.vmem [resolvable:$true] %s169_s26 }
  0x4b   : > { %s185_s4 = sshll.u32 %s1205_s29, 4  ;;  %s1366_s5 = sld [smem:[#allocation5 + $0x3]]  ;;  %s1368_s4 = int_to_ptr.vmem [resolvable:$true] %s185_s4 }
  0x4c   : > { %s1377_s13 = scalar_lea.hbm %s1613_s1, 32768 }
  0x4d   : > { %s662_s8 = sshll.u32 %s143_s15, 4 }
  0x4e   : > { %s145_s11 = scalar_lea.hbm %s1613_s1, %s662_s8  ;;  %s664_s14 = sshll.u32 %s1358_s20, 4 }
  0x4f   : > { %s921_s18 = scalar_lea.hbm %s145_s11, 16  ;;  %p924_p13 = scmp.lt.u32.totalorder %s145_s11, %s1613_s1 }
  0x50   : > { %p922_p9 = scmp.ne.s32.totalorder %s145_s11, %s921_s18  ;;  %p925_p0 = scmp.lt.u32.totalorder %s1377_s13, %s921_s18 }
  0x51   : > { %p927_p11 = scmp.lt.u32.totalorder %s921_s18, %s145_s11 }
  0x52   : > { %p926_p1 = por %p925_p0, %p924_p13 }
  0x54   : > { %p928_p12 = por %p927_p11, %p926_p1 }
  0x56   : > { %p929_p2 = pnand %p928_p12, %p922_p9 }
  0x58   : > { %932 = shalt.err (!%p929_p2)  }
  0x59   : > { %s933_s15 = scalar_lea.vmem %s1360_s17, 16  ;;  %s1386_s20 = scalar_lea.vmem %s1360_s17, 128 }
  0x5a   : > { %p934_p4 = scmp.ne.s32.totalorder %s1360_s17, %s933_s15  ;;  %p938_p6 = scmp.lt.s32.totalorder %s1360_s17, %s1360_s17 }
  0x5b   : > { %p939_p7 = scmp.lt.s32.totalorder %s1386_s20, %s933_s15 }
  0x5d   : > { %p940_p8 = por %p939_p7, %p938_p6 }
  0x5f   : > { %p941_p3 = pnand %p940_p8, %p934_p4 }
  0x61   : > { %944 = shalt.err (!%p941_p3)  }
  0x62   : > { %156 = dma.hbm_to_vmem [thread:$0]  %s145_s11, 16, %s1360_s17, [#allocation3] }
  0x63   : > { %s159_s29 = scalar_lea.hbm %s1613_s1, %s664_s14  ;;  %s666_s8 = sshll.u32 %s1362_s28, 4 }
  0x64   : > { %s945_s9 = scalar_lea.hbm %s159_s29, 16  ;;  %p948_p10 = scmp.lt.u32.totalorder %s159_s29, %s1613_s1 }
  0x65   : > { %p946_p5 = scmp.ne.s32.totalorder %s159_s29, %s945_s9  ;;  %p949_p9 = scmp.lt.u32.totalorder %s1377_s13, %s945_s9 }
  0x66   : > { %p951_p0 = scmp.lt.u32.totalorder %s945_s9, %s159_s29 }
  0x67   : > { %p950_p13 = por %p949_p9, %p948_p10 }
  0x69   : > { %p952_p1 = por %p951_p0, %p950_p13 }
  0x6b   : > { %p953_p11 = pnand %p952_p1, %p946_p5 }
  0x6d   : > { %956 = shalt.err (!%p953_p11)  }
  0x6e   : > { %s957_s11 = scalar_lea.vmem %s1364_s26, 16  ;;  %p962_p2 = scmp.lt.s32.totalorder %s1364_s26, %s1360_s17 }
  0x6f   : > { %p958_p12 = scmp.ne.s32.totalorder %s1364_s26, %s957_s11  ;;  %p963_p4 = scmp.lt.s32.totalorder %s1386_s20, %s957_s11 }
  0x71   : > { %p964_p6 = por %p963_p4, %p962_p2 }
  0x73   : > { %p965_p7 = pnand %p964_p6, %p958_p12 }
  0x75   : > { %968 = shalt.err (!%p965_p7)  }
  0x76   : > { %172 = dma.hbm_to_vmem [thread:$0]  %s159_s29, 16, %s1364_s26, [#allocation3 + $0x1] }
  0x77   : > { %s175_s16 = scalar_lea.hbm %s1613_s1, %s666_s8  ;;  %s668_s21 = sshll.u32 %s1366_s5, 4 }
  0x78   : > { %s969_s15 = scalar_lea.hbm %s175_s16, 16  ;;  %p972_p3 = scmp.lt.u32.totalorder %s175_s16, %s1613_s1 }
  0x79   : > { %p970_p8 = scmp.ne.s32.totalorder %s175_s16, %s969_s15  ;;  %p973_p5 = scmp.lt.u32.totalorder %s1377_s13, %s969_s15 }
  0x7a   : > { %p975_p9 = scmp.lt.u32.totalorder %s969_s15, %s175_s16 }
  0x7b   : > { %p974_p10 = por %p973_p5, %p972_p3 }
  0x7d   : > { %p976_p13 = por %p975_p9, %p974_p10 }
  0x7f   : > { %p977_p0 = pnand %p976_p13, %p970_p8 }
  0x81   : > { %980 = shalt.err (!%p977_p0)  }
  0x82   : > { %s981_s26 = scalar_lea.vmem %s1368_s4, 16  ;;  %p986_p11 = scmp.lt.s32.totalorder %s1368_s4, %s1360_s17 }
  0x83   : > { %p982_p1 = scmp.ne.s32.totalorder %s1368_s4, %s981_s26  ;;  %p987_p12 = scmp.lt.s32.totalorder %s1386_s20, %s981_s26 }
  0x85   : > { %p988_p2 = por %p987_p12, %p986_p11 }
  0x87   : > { %p989_p4 = pnand %p988_p2, %p982_p1 }
  0x89   : > { %992 = shalt.err (!%p989_p4)  }
  0x8a   : > { %188 = dma.hbm_to_vmem [thread:$0]  %s175_s16, 16, %s1368_s4, [#allocation3 + $0x2] }
  0x8b   : > { %s191_s8 = scalar_lea.hbm %s1613_s1, %s668_s21  ;;  %s1206_s9 = smov [#allocation2 + $0x3]  }
  0x8c   : > { %s201_s10 = sshll.u32 %s1206_s9, 4  ;;  %s1423_s18 = sld [smem:[#allocation5 + $0x4]]  ;;  %s202_s10 = int_to_ptr.vmem [resolvable:$true] %s201_s10 }
  0x8d   : > { %s993_s11 = scalar_lea.hbm %s191_s8, 16  ;;  %p996_p7 = scmp.lt.u32.totalorder %s191_s8, %s1613_s1 }
  0x8e   : > { %p994_p6 = scmp.ne.s32.totalorder %s191_s8, %s993_s11  ;;  %p997_p8 = scmp.lt.u32.totalorder %s1377_s13, %s993_s11 }
  0x8f   : > { %p999_p5 = scmp.lt.u32.totalorder %s993_s11, %s191_s8 }
  0x90   : > { %p998_p3 = por %p997_p8, %p996_p7 }
  0x92   : > { %p1000_p10 = por %p999_p5, %p998_p3 }
  0x94   : > { %p1001_p9 = pnand %p1000_p10, %p994_p6 }
  0x96   : > { %1004 = shalt.err (!%p1001_p9)  }
  0x97   : > { %s1005_s4 = scalar_lea.vmem %s202_s10, 16  ;;  %p1010_p0 = scmp.lt.s32.totalorder %s202_s10, %s1360_s17 }
  0x98   : > { %p1006_p13 = scmp.ne.s32.totalorder %s202_s10, %s1005_s4  ;;  %p1011_p1 = scmp.lt.s32.totalorder %s1386_s20, %s1005_s4 }
  0x9a   : > { %p1012_p11 = por %p1011_p1, %p1010_p0 }
  0x9c   : > { %p1013_p12 = pnand %p1012_p11, %p1006_p13 }
  0x9e   : > { %1016 = shalt.err (!%p1013_p12)  }
  0x9f   : > { %204 = dma.hbm_to_vmem [thread:$0]  %s191_s8, 16, %s202_s10, [#allocation3 + $0x3] }
  0xa0   : > { %s1207_s16 = smov [#allocation2 + $0x4]   ;;  %s1431_s15 = sld [smem:[#allocation5 + $0x5]] }
  0xa1   : > { %s217_s21 = sshll.u32 %s1207_s16, 4  ;;  %s1208_s2 = smov [#allocation2 + $0x5]   ;;  %s218_s21 = int_to_ptr.vmem [resolvable:$true] %s217_s21 }
  0xa2   : > { %s233_s30 = sshll.u32 %s1208_s2, 4  ;;  %s1433_s26 = sld [smem:[#allocation5 + $0x6]]  ;;  %s1436_s30 = int_to_ptr.vmem [resolvable:$true] %s233_s30 }
  0xa3   : > { %s670_s5 = sshll.u32 %s1423_s18, 4 }
  0xa4   : > { %s207_s11 = scalar_lea.hbm %s1613_s1, %s670_s5 }
  0xa5   : > { %s1017_s28 = scalar_lea.hbm %s207_s11, 16  ;;  %p1020_p4 = scmp.lt.u32.totalorder %s207_s11, %s1613_s1 }
  0xa6   : > { %p1018_p2 = scmp.ne.s32.totalorder %s207_s11, %s1017_s28  ;;  %p1021_p6 = scmp.lt.u32.totalorder %s1377_s13, %s1017_s28 }
  0xa7   : > { %p1023_p8 = scmp.lt.u32.totalorder %s1017_s28, %s207_s11 }
  0xa8   : > { %p1022_p7 = por %p1021_p6, %p1020_p4 }
  0xaa   : > { %p1024_p3 = por %p1023_p8, %p1022_p7 }
  0xac   : > { %p1025_p5 = pnand %p1024_p3, %p1018_p2 }
  0xae   : > { %1028 = shalt.err (!%p1025_p5)  }
  0xaf   : > { %s1029_s14 = scalar_lea.vmem %s218_s21, 16  ;;  %p1034_p9 = scmp.lt.s32.totalorder %s218_s21, %s1360_s17 }
  0xb0   : > { %p1030_p10 = scmp.ne.s32.totalorder %s218_s21, %s1029_s14  ;;  %p1035_p13 = scmp.lt.s32.totalorder %s1386_s20, %s1029_s14 }
  0xb2   : > { %p1036_p0 = por %p1035_p13, %p1034_p9 }
  0xb4   : > { %p1037_p1 = pnand %p1036_p0, %p1030_p10 }
  0xb6   : > { %1040 = shalt.err (!%p1037_p1)  }
  0xb7   : > { %220 = dma.hbm_to_vmem [thread:$0]  %s207_s11, 16, %s218_s21, [#allocation3 + $0x4] }
  0xb8   : > { %s672_s18 = sshll.u32 %s1431_s15, 4  ;;  %s1209_s4 = smov [#allocation2 + $0x6]  }
  0xb9   : > { %s249_s16 = sshll.u32 %s1209_s4, 4  ;;  %s223_s29 = scalar_lea.hbm %s1613_s1, %s672_s18  ;;  %s1451_s16 = int_to_ptr.vmem [resolvable:$true] %s249_s16 }
  0xba   : > { %s1041_s9 = scalar_lea.hbm %s223_s29, 16  ;;  %p1044_p12 = scmp.lt.u32.totalorder %s223_s29, %s1613_s1 }
  0xbb   : > { %p1042_p11 = scmp.ne.s32.totalorder %s223_s29, %s1041_s9  ;;  %p1045_p2 = scmp.lt.u32.totalorder %s1377_s13, %s1041_s9 }
  0xbc   : > { %p1047_p6 = scmp.lt.u32.totalorder %s1041_s9, %s223_s29 }
  0xbd   : > { %p1046_p4 = por %p1045_p2, %p1044_p12 }
  0xbf   : > { %p1048_p7 = por %p1047_p6, %p1046_p4 }
  0xc1   : > { %p1049_p8 = pnand %p1048_p7, %p1042_p11 }
  0xc3   : > { %1052 = shalt.err (!%p1049_p8)  }
  0xc4   : > { %s1053_s21 = scalar_lea.vmem %s1436_s30, 16  ;;  %p1058_p5 = scmp.lt.s32.totalorder %s1436_s30, %s1360_s17 }
  0xc5   : > { %p1054_p3 = scmp.ne.s32.totalorder %s1436_s30, %s1053_s21  ;;  %p1059_p10 = scmp.lt.s32.totalorder %s1386_s20, %s1053_s21 }
  0xc7   : > { %p1060_p9 = por %p1059_p10, %p1058_p5 }
  0xc9   : > { %p1061_p13 = pnand %p1060_p9, %p1054_p3 }
  0xcb   : > { %1064 = shalt.err (!%p1061_p13)  }
  0xcc   : > { %236 = dma.hbm_to_vmem [thread:$0]  %s223_s29, 16, %s1436_s30, [#allocation3 + $0x5] }
  0xcd   : > { %s674_s15 = sshll.u32 %s1433_s26, 4  ;;  %s675_s11 = sld [smem:[#allocation5 + $0x7]] }
  0xce   : > { %s239_s18 = scalar_lea.hbm %s1613_s1, %s674_s15 }
  0xcf   : > { %s1065_s4 = scalar_lea.hbm %s239_s18, 16  ;;  %p1068_p1 = scmp.lt.u32.totalorder %s239_s18, %s1613_s1 }
  0xd0   : > { %p1066_p0 = scmp.ne.s32.totalorder %s239_s18, %s1065_s4  ;;  %p1069_p11 = scmp.lt.u32.totalorder %s1377_s13, %s1065_s4 }
  0xd1   : > { %p1071_p2 = scmp.lt.u32.totalorder %s1065_s4, %s239_s18 }
  0xd2   : > { %p1070_p12 = por %p1069_p11, %p1068_p1 }
  0xd4   : > { %p1072_p4 = por %p1071_p2, %p1070_p12 }
  0xd6   : > { %p1073_p6 = pnand %p1072_p4, %p1066_p0 }
  0xd8   : > { %1076 = shalt.err (!%p1073_p6)  }
  0xd9   : > { %s1077_s30 = scalar_lea.vmem %s1451_s16, 16  ;;  %p1082_p8 = scmp.lt.s32.totalorder %s1451_s16, %s1360_s17 }
  0xda   : > { %p1078_p7 = scmp.ne.s32.totalorder %s1451_s16, %s1077_s30  ;;  %p1083_p3 = scmp.lt.s32.totalorder %s1386_s20, %s1077_s30 }
  0xdc   : > { %p1084_p5 = por %p1083_p3, %p1082_p8 }
  0xde   : > { %p1085_p10 = pnand %p1084_p5, %p1078_p7 }
  0xe0   : > { %1088 = shalt.err (!%p1085_p10)  }
  0xe1   : > { %252 = dma.hbm_to_vmem [thread:$0]  %s239_s18, 16, %s1451_s16, [#allocation3 + $0x6] }
  0xe2   : > { %s1210_s26 = smov [#allocation2 + $0x7]   ;;  %s676_s9 = sshll.u32 %s675_s11, 4 }
  0xe3   : > { %s265_s29 = sshll.u32 %s1210_s26, 4  ;;  %s255_s21 = scalar_lea.hbm %s1613_s1, %s676_s9  ;;  %s266_s29 = int_to_ptr.vmem [resolvable:$true] %s265_s29 }
  0xe4   : > { %s1089_s15 = scalar_lea.hbm %s255_s21, 16  ;;  %p1092_p13 = scmp.lt.u32.totalorder %s255_s21, %s1613_s1 }
  0xe5   : > { %p1090_p9 = scmp.ne.s32.totalorder %s255_s21, %s1089_s15  ;;  %p1093_p0 = scmp.lt.u32.totalorder %s1377_s13, %s1089_s15 }
  0xe6   : > { %p1095_p11 = scmp.lt.u32.totalorder %s1089_s15, %s255_s21 }
  0xe7   : > { %p1094_p1 = por %p1093_p0, %p1092_p13 }
  0xe9   : > { %p1096_p12 = por %p1095_p11, %p1094_p1 }
  0xeb   : > { %p1097_p2 = pnand %p1096_p12, %p1090_p9 }
  0xed   : > { %1100 = shalt.err (!%p1097_p2)  }
  0xee   : > { %s1101_s16 = scalar_lea.vmem %s266_s29, 16  ;;  %p1106_p6 = scmp.lt.s32.totalorder %s266_s29, %s1360_s17 }
  0xef   : > { %p1102_p4 = scmp.ne.s32.totalorder %s266_s29, %s1101_s16  ;;  %p1107_p7 = scmp.lt.s32.totalorder %s1386_s20, %s1101_s16 }
  0xf1   : > { %p1108_p8 = por %p1107_p7, %p1106_p6 }
  0xf3   : > { %p1109_p3 = pnand %p1108_p8, %p1102_p4 }
  0xf5   : > { %1112 = shalt.err (!%p1109_p3)  }
  0xf6   : > { %268 = dma.hbm_to_vmem [thread:$0]  %s255_s21, 16, %s266_s29, [#allocation3 + $0x7] }
  0xf7   : > { %s1625_s11 = sshll.u32 %s1347_s12, 5 }
  0xf8   : > { %s1488_s18 = scalar_lea.vmem [#allocation9], %s1625_s11 }
  0xf9   : > { %1163 = dma.done.wait [#allocation3], 16 }
  0xfa   : > { %1164 = vsyncadd [#allocation3], 4294967280 }
  0xfb   : > { %1165 = dma.done.wait [#allocation3 + $0x1], 16 }
  0xfc   : > { %1166 = vsyncadd [#allocation3 + $0x1], 4294967280 }
  0xfd   : > { %1167 = dma.done.wait [#allocation3 + $0x2], 16 }
  0xfe   : > { %1168 = vsyncadd [#allocation3 + $0x2], 4294967280 }
  0xff   : > { %1169 = dma.done.wait [#allocation3 + $0x3], 16 }
 0x100   : > { %1170 = vsyncadd [#allocation3 + $0x3], 4294967280 }
 0x101   : > { %1171 = dma.done.wait [#allocation3 + $0x4], 16 }
 0x102   : > { %1172 = vsyncadd [#allocation3 + $0x4], 4294967280 }
 0x103   : > { %1173 = dma.done.wait [#allocation3 + $0x5], 16 }
 0x104   : > { %1174 = vsyncadd [#allocation3 + $0x5], 4294967280 }
 0x105   : > { %1175 = dma.done.wait [#allocation3 + $0x6], 16 }
 0x106   : > { %1176 = vsyncadd [#allocation3 + $0x6], 4294967280 }
 0x107   : > { %1177 = dma.done.wait [#allocation3 + $0x7], 16 }
 0x108   : > { %1178 = vsyncadd [#allocation3 + $0x7], 4294967280  ;;  %v303_v0 = vld [vmem:[%s1351_s19 + $0x80] sm:$0xff]  ;;  %v304_v1 = vld [vmem:[%s1351_s19 + $0x88] sm:$0xff]  ;;  %s691_s13 = sshll.u32 %s1265_s0, 9  ;;  %s512_s17 = sshll.u32 %s1488_s18, 4  ;;  %s1568_s17 = int_to_ptr.vmem [resolvable:$true] %s512_s17 }
 0x109   : > { %v335_v2 = vld [vmem:[%s1351_s19 + $0x180] sm:$0xff]  ;;  %v760_v3 = vpack.c.bf16 %v304_v1, %v303_v0  ;;  %v336_v4 = vld [vmem:[%s1351_s19 + $0x188] sm:$0xff]  ;;  %v305_v11 = vld [vmem:[%s1351_s19 + $0x90] sm:$0xff]  ;;  %s1566_s4 = scalar_lea.hbm %s1615_s3, %s691_s13  ;;  %s498_s0 = scalar_lea.sflag [#allocation8], %s1347_s12 }
 0x10a   : > { %v287_v5 = vld [vmem:[%s1351_s19] sm:$0xff]  ;;  %v288_v6 = vld [vmem:[%s1351_s19 + $0x8] sm:$0xff]  ;;  %v792_v7 = vpack.c.bf16 %v336_v4, %v335_v2  ;;  %v306_v13 = vld [vmem:[%s1351_s19 + $0x98] sm:$0xff]  ;;  %s1113_s2 = scalar_lea.vmem %s1568_s17, 512  ;;  %p1626_p10 = scmp.ne.s32.totalorder %s1621_s6, 0 }
 0x10b   : > { %v762_v8 = vpack.c.bf16 %v288_v6, %v287_v5  ;;  %v319_v9 = vld [vmem:[%s1351_s19 + $0x100] sm:$0xff]  ;;  %v320_v10 = vld [vmem:[%s1351_s19 + $0x108] sm:$0xff]  ;;  %761 = vmatprep.subr.bf16.mxu0 %v760_v3  ;;  %v337_v14 = vld [vmem:[%s1351_s19 + $0x190] sm:$0xff]  ;;  %v764_v16 = vpack.c.bf16 %v306_v13, %v305_v11  ;;  %p1114_p5 = scmp.ne.s32.totalorder %s1568_s17, %s1113_s2  ;;  %s1211_s5 = smov [#allocation9]  }
 0x10c   : > { %v794_v12 = vpack.c.bf16 %v320_v10, %v319_v9  ;;  %v338_v15 = vld [vmem:[%s1351_s19 + $0x198] sm:$0xff]  ;;  %793 = vmatprep.subr.bf16.mxu1 %v792_v7  ;;  %v289_v18 = vld [vmem:[%s1351_s19 + $0x10] sm:$0xff]  ;;  %v307_v22 = vld [vmem:[%s1351_s19 + $0xa0] sm:$0xff]  ;;  %s1117_s30 = sshll.u32 %s1211_s5, 4  ;;  %s1118_s30 = int_to_ptr.vmem [resolvable:$false] %s1117_s30 }
 0x10d   : > { %763 = vmatpush3.bf16.xpose.msra.mxu0 %v762_v8  ;;  %v796_v17 = vpack.c.bf16 %v338_v15, %v337_v14  ;;  %v290_v19 = vld [vmem:[%s1351_s19 + $0x18] sm:$0xff]  ;;  %v321_v20 = vld [vmem:[%s1351_s19 + $0x110] sm:$0xff]  ;;  %v308_v23 = vld [vmem:[%s1351_s19 + $0xa8] sm:$0xff]  ;;  %p1115_p9 = pnand %p1114_p5, %p1626_p10  ;;  %s1119_s26 = scalar_lea.vmem %s1118_s30, 1024 }
 0x10e   : > { %795 = vmatpush3.bf16.xpose.msra.mxu1 %v794_v12  ;;  %765 = vmatprep.subr.bf16.mxu0 %v764_v16  ;;  %v322_v21 = vld [vmem:[%s1351_s19 + $0x118] sm:$0xff]  ;;  %v339_v24 = vld [vmem:[%s1351_s19 + $0x1a0] sm:$0xff]  ;;  %v340_v25 = vld [vmem:[%s1351_s19 + $0x1a8] sm:$0xff]  ;;  %v766_v26 = vpack.c.bf16 %v290_v19, %v289_v18  ;;  %v768_v28 = vpack.c.bf16 %v308_v23, %v307_v22  ;;  %p1120_p0 = scmp.lt.s32.totalorder %s1568_s17, %s1118_s30  ;;  %p1121_p1 = scmp.lt.s32.totalorder %s1119_s26, %s1113_s2 }
 0x10f   : > { %797 = vmatprep.subr.bf16.mxu1 %v796_v17  ;;  %v798_v27 = vpack.c.bf16 %v322_v21, %v321_v20  ;;  %v800_v29 = vpack.c.bf16 %v340_v25, %v339_v24  ;;  %v291_v30 = vld [vmem:[%s1351_s19 + $0x20] sm:$0xff]  ;;  %v292_v31 = vld [vmem:[%s1351_s19 + $0x28] sm:$0xff]  ;;  %v309_v34 = vld [vmem:[%s1351_s19 + $0xb0] sm:$0xff]  ;;  %p1116_p13 = pneg %p1115_p9 }
 0x110   : > { %v323_v32 = vld [vmem:[%s1351_s19 + $0x120] sm:$0xff]  ;;  %v324_v33 = vld [vmem:[%s1351_s19 + $0x128] sm:$0xff]  ;;  %v310_v35 = vld [vmem:[%s1351_s19 + $0xb8] sm:$0xff]  ;;  %v770_v38 = vpack.c.bf16 %v292_v31, %v291_v30  ;;  %p1122_p11 = por %p1121_p1, %p1120_p0 }
 0x111   : > { %v341_v36 = vld [vmem:[%s1351_s19 + $0x1b0] sm:$0xff]  ;;  %v342_v37 = vld [vmem:[%s1351_s19 + $0x1b8] sm:$0xff]  ;;  %v802_v39 = vpack.c.bf16 %v324_v33, %v323_v32  ;;  %v772_v40 = vpack.c.bf16 %v310_v35, %v309_v34  ;;  %v311_v47 = vld [vmem:[%s1351_s19 + $0xc0] sm:$0xff] }
 0x112   : > { %v804_v41 = vpack.c.bf16 %v342_v37, %v341_v36  ;;  %v293_v42 = vld [vmem:[%s1351_s19 + $0x30] sm:$0xff]  ;;  %v294_v43 = vld [vmem:[%s1351_s19 + $0x38] sm:$0xff]  ;;  %v312_v48 = vld [vmem:[%s1351_s19 + $0xc8] sm:$0xff]  ;;  %p1123_p12 = pnand %p1122_p11, %p1116_p13 }
 0x113   : > { %v325_v44 = vld [vmem:[%s1351_s19 + $0x130] sm:$0xff]  ;;  %v1521_v45 = vld [vmem:[#allocation2] sm:$0xff]  ;;  %v343_v49 = vld [vmem:[%s1351_s19 + $0x1c0] sm:$0xff]  ;;  %v774_v51 = vpack.c.bf16 %v294_v43, %v293_v42  ;;  %v776_v53 = vpack.c.bf16 %v312_v48, %v311_v47 }
 0x114   : > { %v326_v46 = vld [vmem:[%s1351_s19 + $0x138] sm:$0xff]  ;;  %724 = vmatprep.mubr.f32.mxu0 %v1521_v45  ;;  %v344_v50 = vld [vmem:[%s1351_s19 + $0x1c8] sm:$0xff]  ;;  %758 = vmatprep.mubr.f32.mxu1 %v1521_v45  ;;  %v295_v55 = vld [vmem:[%s1351_s19 + $0x40] sm:$0xff] }
 0x115   : > { %767 = vmatpush3.bf16.xpose.msra.mxu0 %v766_v26  ;;  %v806_v52 = vpack.c.bf16 %v326_v46, %v325_v44  ;;  %v808_v54 = vpack.c.bf16 %v344_v50, %v343_v49  ;;  %v296_v56 = vld [vmem:[%s1351_s19 + $0x48] sm:$0xff]  ;;  %v327_v57 = vld [vmem:[%s1351_s19 + $0x140] sm:$0xff]  ;;  %v313_v59 = vld [vmem:[%s1351_s19 + $0xd0] sm:$0xff] }
 0x116   : > { %799 = vmatpush3.bf16.xpose.msra.mxu1 %v798_v27  ;;  %769 = vmatprep.subr.bf16.mxu0 %v768_v28  ;;  %v328_v58 = vld [vmem:[%s1351_s19 + $0x148] sm:$0xff]  ;;  %v314_v60 = vld [vmem:[%s1351_s19 + $0xd8] sm:$0xff]  ;;  %v345_v61 = vld [vmem:[%s1351_s19 + $0x1d0] sm:$0xff]  ;;  %v778_v63 = vpack.c.bf16 %v296_v56, %v295_v55 }
 0x117   : > { %801 = vmatprep.subr.bf16.mxu1 %v800_v29  ;;  %v346_v62 = vld [vmem:[%s1351_s19 + $0x1d8] sm:$0xff]  ;;  %v810_v0 = vpack.c.bf16 %v328_v58, %v327_v57  ;;  %v780_v1 = vpack.c.bf16 %v314_v60, %v313_v59  ;;  %v297_v3 = vld [vmem:[%s1351_s19 + $0x50] sm:$0xff]  ;;  %v315_v7 = vld [vmem:[%s1351_s19 + $0xe0] sm:$0xff] }
 0x118   : > { %v812_v2 = vpack.c.bf16 %v346_v62, %v345_v61  ;;  %v298_v4 = vld [vmem:[%s1351_s19 + $0x58] sm:$0xff]  ;;  %v329_v5 = vld [vmem:[%s1351_s19 + $0x150] sm:$0xff]  ;;  %v316_v8 = vld [vmem:[%s1351_s19 + $0xe8] sm:$0xff] }
 0x119   : > { %v330_v6 = vld [vmem:[%s1351_s19 + $0x158] sm:$0xff]  ;;  %v347_v9 = vld [vmem:[%s1351_s19 + $0x1e0] sm:$0xff]  ;;  %v348_v10 = vld [vmem:[%s1351_s19 + $0x1e8] sm:$0xff]  ;;  %v782_v11 = vpack.c.bf16 %v298_v4, %v297_v3  ;;  %v784_v13 = vpack.c.bf16 %v316_v8, %v315_v7 }
 0x11a   : > { %v814_v12 = vpack.c.bf16 %v330_v6, %v329_v5  ;;  %v816_v14 = vpack.c.bf16 %v348_v10, %v347_v9  ;;  %v299_v15 = vld [vmem:[%s1351_s19 + $0x60] sm:$0xff]  ;;  %v300_v16 = vld [vmem:[%s1351_s19 + $0x68] sm:$0xff]  ;;  %v317_v19 = vld [vmem:[%s1351_s19 + $0xf0] sm:$0xff] }
 0x11b   : > { %v331_v17 = vld [vmem:[%s1351_s19 + $0x160] sm:$0xff]  ;;  %v332_v18 = vld [vmem:[%s1351_s19 + $0x168] sm:$0xff]  ;;  %v318_v20 = vld [vmem:[%s1351_s19 + $0xf8] sm:$0xff]  ;;  %v786_v23 = vpack.c.bf16 %v300_v16, %v299_v15 }
 0x11c   : > { %v349_v21 = vld [vmem:[%s1351_s19 + $0x1f0] sm:$0xff]  ;;  %v350_v22 = vld [vmem:[%s1351_s19 + $0x1f8] sm:$0xff]  ;;  %v818_v24 = vpack.c.bf16 %v332_v18, %v331_v17  ;;  %v788_v25 = vpack.c.bf16 %v318_v20, %v317_v19 }
 0x11d   : > { %771 = vmatpush3.bf16.xpose.msra.mxu0 %v770_v38  ;;  %v820_v26 = vpack.c.bf16 %v350_v22, %v349_v21  ;;  %v301_v27 = vld [vmem:[%s1351_s19 + $0x70] sm:$0xff]  ;;  %v302_v28 = vld [vmem:[%s1351_s19 + $0x78] sm:$0xff] }
 0x11e   : > { %803 = vmatpush3.bf16.xpose.msra.mxu1 %v802_v39  ;;  %773 = vmatprep.subr.bf16.mxu0 %v772_v40  ;;  %v333_v29 = vld [vmem:[%s1351_s19 + $0x170] sm:$0xff]  ;;  %v334_v30 = vld [vmem:[%s1351_s19 + $0x178] sm:$0xff]  ;;  %v790_v31 = vpack.c.bf16 %v302_v28, %v301_v27 }
 0x11f   : > { %805 = vmatprep.subr.bf16.mxu1 %v804_v41  ;;  %v822_v32 = vpack.c.bf16 %v334_v30, %v333_v29 }
 0x125   : > { %775 = vmatpush3.bf16.xpose.msra.mxu0 %v774_v51 }
 0x126   : > { %807 = vmatpush3.bf16.xpose.msra.mxu1 %v806_v52  ;;  %777 = vmatprep.subr.bf16.mxu0 %v776_v53 }
 0x127   : > { %809 = vmatprep.subr.bf16.mxu1 %v808_v54 }
 0x12d   : > { %779 = vmatpush3.bf16.xpose.msra.mxu0 %v778_v63 }
 0x12e   : > { %811 = vmatpush3.bf16.xpose.msra.mxu1 %v810_v0  ;;  %781 = vmatprep.subr.bf16.mxu0 %v780_v1 }
 0x12f   : > { %813 = vmatprep.subr.bf16.mxu1 %v812_v2 }
 0x135   : > { %783 = vmatpush3.bf16.xpose.msra.mxu0 %v782_v11 }
 0x136   : > { %815 = vmatpush3.bf16.xpose.msra.mxu1 %v814_v12  ;;  %785 = vmatprep.subr.bf16.mxu0 %v784_v13 }
 0x137   : > { %817 = vmatprep.subr.bf16.mxu1 %v816_v14 }
 0x13d   : > { %787 = vmatpush3.bf16.xpose.msra.mxu0 %v786_v23 }
 0x13e   : > { %819 = vmatpush3.bf16.xpose.msra.mxu1 %v818_v24  ;;  %789 = vmatprep.subr.bf16.mxu0 %v788_v25 }
 0x13f   : > { %821 = vmatprep.subr.bf16.mxu1 %v820_v26 }
 0x145   : > { %791 = vmatpush3.bf16.xpose.msra.mxu0 %v790_v31 }
 0x146   : > { %823 = vmatpush3.bf16.xpose.msra.mxu1 %v822_v32 }
 0x14c   : > { %725 = vmatmul.mubr.f32.vlgmr.msra.gmra.mrb[0].mxu0 %v1521_v45 }
 0x14d   : > { %759 = vmatmul.mubr.f32.vlgmr.msra.gmra.mrb[0].mxu1 %v1521_v45 }
 0x21f   : > { %v417_v33 = vpop.f32.mrb[0].mxu0 }
 0x220   : > { %493 = vst [vmem:[%s1488_s18] sm:$0xff] %v417_v33  ;;  %v488_v34 = vpop.f32.mrb[0].mxu1  ;;  %v419_v35 = vpop.f32.mrb[1].mxu0 }
 0x221   : > { %495 = vst [vmem:[%s1488_s18 + $0x10] sm:$0xff] %v488_v34  ;;  %494 = vst [vmem:[%s1488_s18 + $0x8] sm:$0xff] %v419_v35  ;;  %v490_v36 = vpop.f32.mrb[1].mxu1 }
 0x222   : > { %496 = vst [vmem:[%s1488_s18 + $0x18] sm:$0xff] %v490_v36 }
 0x223   : > { %1126 = shalt.err (!%p1123_p12)
}
 0x224   : > { %s1127_s12 = scalar_lea.hbm %s1566_s4, 512  ;;  %s1131_s28 = scalar_lea.hbm %s1615_s3, 2048 }
 0x225   : > { %p1128_p2 = scmp.ne.s32.totalorder %s1566_s4, %s1127_s12  ;;  %p1132_p7 = scmp.lt.u32.totalorder %s1566_s4, %s1615_s3 }
 0x226   : > { %p1133_p8 = scmp.lt.u32.totalorder %s1131_s28, %s1127_s12  ;;  %p1135_p5 = scmp.lt.u32.totalorder %s1127_s12, %s1566_s4 }
 0x227   : > { %p1129_p4 = pnand %p1128_p2, %p1626_p10 }
 0x228   : > { %p1134_p3 = por %p1133_p8, %p1132_p7 }
 0x229   : > { %p1130_p6 = pneg %p1129_p4 }
 0x22a   : > { %p1136_p9 = por %p1135_p5, %p1134_p3 }
 0x22c   : > { %p1137_p13 = pnand %p1136_p9, %p1130_p6 }
 0x22e   : > { %1140 = shalt.err (!%p1137_p13)
}
 0x22f   : > { %826 = dma.vmem_to_hbm [thread:$0]  (%p1626_p10), %s1568_s17, 512, %s1566_s4, %s498_s0  }
 0x230 PF: > { %p837_p0 = scmp.ge.s32.totalorder %s1197_s25, 2  ;;  %s524_s15 = sand.u32 1, %s1185_s22  }
 0x231   : > { %p1627_p1 = scmp.ne.s32.totalorder %s1622_s7, 0  ;;  %s525_s10 = scalar_lea.sflag [#allocation8], %s524_s15 }
 0x233   : > { %p833_p11 = pnand %p837_p0, %p1627_p1 }
 0x235   : > { %1180 = dma.done.wait (!%p833_p11), %s525_s10, 512  }
 0x236   : > { %1182 = vsyncadd (!%p833_p11), %s525_s10, 4294966784  ;;  %s1628_s14 = sld [smem:[#allocation39_spill]]  ;;  %p20_p12 = scmp.ge.s32.totalorder %s1269_s27, 6  }
 0x237   : > { %s1629_s22 = smov %s1189_s23  ;;  %s1630_s23 = smov %s1193_s24 }
 0x238   : > { %s1632_s25 = smov %s1269_s27  ;;  %22 = sbr.rel (!%p20_p12) target bundleno = 17 (0x11), region = 130 }
 0x23c   : > { %s1631_s24 = smov %s1628_s14 }
 0x23f   :  { %530 = vsyncpa [#allocation7], 1 }
 0x240   :  { %532 = vsyncpa [#allocation7 + $0x1], 1 }
 0x241   :  { %533 = vsyncpa [#allocation8], 1 }
 0x242   :  { %535 = vsyncpa [#allocation8 + $0x1], 1 }
 0x243   :  { %536 = vsyncmov [#allocation3] }
 0x246   :  { %s537_s25 = vpop.sfrf %536 }
 0x247   :  { %p682_p10 = scmp.ne.s32.totalorder %s537_s25, 0 }
 0x249   :  { %541 = shalt.err (%p682_p10)  }
 0x24a   :  { %543 = vsyncmov [#allocation3 + $0x1] }
 0x24d   :  { %s544_s6 = vpop.sfrf %543 }
 0x24e   :  { %p683_p2 = scmp.ne.s32.totalorder %s544_s6, 0 }
 0x250   :  { %548 = shalt.err (%p683_p2)  }
 0x251   :  { %550 = vsyncmov [#allocation3 + $0x2] }
 0x254   :  { %s551_s7 = vpop.sfrf %550 }
 0x255   :  { %p684_p4 = scmp.ne.s32.totalorder %s551_s7, 0 }
 0x257   :  { %555 = shalt.err (%p684_p4)  }
 0x258   :  { %557 = vsyncmov [#allocation3 + $0x3] }
 0x25b   :  { %s558_s16 = vpop.sfrf %557 }
 0x25c   :  { %p685_p6 = scmp.ne.s32.totalorder %s558_s16, 0 }
 0x25e   :  { %562 = shalt.err (%p685_p6)  }
 0x25f   :  { %564 = vsyncmov [#allocation3 + $0x4] }
 0x262   :  { %s565_s1 = vpop.sfrf %564 }
 0x263   :  { %p686_p7 = scmp.ne.s32.totalorder %s565_s1, 0 }
 0x265   :  { %569 = shalt.err (%p686_p7)  }
 0x266   :  { %571 = vsyncmov [#allocation3 + $0x5] }
 0x269   :  { %s572_s3 = vpop.sfrf %571 }
 0x26a   :  { %p687_p8 = scmp.ne.s32.totalorder %s572_s3, 0 }
 0x26c   :  { %576 = shalt.err (%p687_p8)  }
 0x26d   :  { %578 = vsyncmov [#allocation3 + $0x6] }
 0x270   :  { %s579_s22 = vpop.sfrf %578 }
 0x271   :  { %p688_p3 = scmp.ne.s32.totalorder %s579_s22, 0 }
 0x273   :  { %583 = shalt.err (%p688_p3)  }
 0x274   :  { %585 = vsyncmov [#allocation3 + $0x7] }
 0x277   :  { %s586_s23 = vpop.sfrf %585 }
 0x278   :  { %p689_p5 = scmp.ne.s32.totalorder %s586_s23, 0 }
 0x27a   :  { %590 = shalt.err (%p689_p5)  }

</bundles_post_ra>
